<compile_context>
chip_gen: v6e
topology: v6e:2x2x1
jax: 0.10.0
libtpu: 0.0.40
codegen_flags: <defaults>
</compile_context>

<pallas_src>
import functools

import jax
import jax.numpy as jnp
from jax import lax
from jax.experimental import pallas as pl
from jax.experimental.pallas import tpu as pltpu


def _round_up(x: int, m: int) -> int:
    return ((x + m - 1) // m) * m


def _style_loss_kernel(img_ref, tgt_ref, out_ref, acc_ref, *, total_scale):
    """Grid: (K_padded // TK,). acc_ref accumulates the unscaled gram diff."""
    kstep = pl.program_id(0)

    @pl.when(kstep == 0)
    def _init():
        acc_ref[...] = jnp.zeros_like(acc_ref)

    x = img_ref[...]
    y = tgt_ref[...]
    # Contract over the shared K axis directly (no transpose materialized).
    dims = (((1,), (1,)), ((), ()))
    g = lax.dot_general(x, x, dimension_numbers=dims,
                        preferred_element_type=jnp.float32)
    t = lax.dot_general(y, y, dimension_numbers=dims,
                        preferred_element_type=jnp.float32)
    acc_ref[...] += g - t

    @pl.when(kstep == pl.num_programs(0) - 1)
    def _finalize():
        d = acc_ref[...]
        out_ref[0, 0] = jnp.sum(d * d) * total_scale


def style_loss(img, target_img, *, compute_dtype=jnp.float32, tk=None):
    """img, target_img: (N, C, H, W). Returns scalar float32 StyleLoss."""
    n, c, h, w = img.shape
    m, k = n * c, h * w

    # Fold all normalization into one scalar applied once at the very end.
    gram_scale = 1.0 / float(m * k)
    mse_scale = 1.0 / float(m * m)
    total_scale = gram_scale * gram_scale * mse_scale

    feat_img = img.reshape(m, k).astype(compute_dtype)
    feat_tgt = target_img.reshape(m, k).astype(compute_dtype)

    itemsize = jnp.dtype(compute_dtype).itemsize
    sublane = 8 * (4 // itemsize)          # 8 for f32, 16 for bf16
    lane = 128

    # Pad M to a sublane multiple; padded (zero) rows only add zero gram
    # rows/cols, which cancel in the diff and don't change the sum.
    mp = _round_up(m, sublane)

    # Size TK so 2 inputs x 2 pipeline buffers stay ~<= 8 MiB (fits the
    # default scoped-VMEM limit on every generation, incl. v7x's 64 MiB VMEM).
    if tk is None:
        budget = 8 * 1024 * 1024
        max_tk = max(lane, (budget // (4 * mp * itemsize)) // lane * lane)
        tk = min(_round_up(k, lane), max_tk)
    kp = _round_up(k, tk)                  # padded (zero) K cols add nothing

    if (mp, kp) != (m, k):
        pad = ((0, mp - m), (0, kp - k))
        feat_img = jnp.pad(feat_img, pad)
        feat_tgt = jnp.pad(feat_tgt, pad)

    grid = (kp // tk,)

    out = pl.pallas_call(
        functools.partial(_style_loss_kernel, total_scale=total_scale),
        out_shape=jax.ShapeDtypeStruct((1, 1), jnp.float32),
        grid_spec=pltpu.PrefetchScalarGridSpec(
            num_scalar_prefetch=0,
            grid=grid,
            in_specs=[
                pl.BlockSpec((mp, tk), lambda kk: (0, kk)),
                pl.BlockSpec((mp, tk), lambda kk: (0, kk)),
            ],
            out_specs=pl.BlockSpec(memory_space=pltpu.MemorySpace.SMEM),
            scratch_shapes=[pltpu.VMEM((mp, mp), jnp.float32)],
        ),
        compiler_params=pltpu.CompilerParams(
            dimension_semantics=("arbitrary",),   # K is a reduction axis
        ),
        cost_estimate=pl.CostEstimate(
            flops=2 * (2 * mp * mp * kp),
            transcendentals=0,
            bytes_accessed=2 * mp * kp * itemsize + 4,
        ),
    )(feat_img, feat_tgt)
    return out[0, 0]


def _style_loss_ref(img, target_img):
    """Pure-JAX reference mirroring the PyTorch module."""
    n, c, h, w = img.shape
    f = img.reshape(n * c, h * w).astype(jnp.float32)
    ft = target_img.reshape(n * c, h * w).astype(jnp.float32)
    g = (f @ f.T) / (n * c * h * w)
    t = (ft @ ft.T) / (n * c * h * w)
    return jnp.mean((g - t) ** 2)


if __name__ == "__main__":
    key = jax.random.PRNGKey(0)
    k1, k2 = jax.random.split(key)

    # Small shapes consistent with the module: (N, C, H, W) = (2, 4, 16, 16)
    img = jax.random.normal(k1, (2, 4, 16, 16), dtype=jnp.float32)
    target_img = jax.random.normal(k2, (2, 4, 16, 16), dtype=jnp.float32)

    loss = style_loss(img, target_img)
    loss = jax.block_until_ready(loss)

    ref = _style_loss_ref(img, target_img)
    assert jnp.allclose(loss, ref, rtol=1e-5, atol=1e-6), (loss, ref)

    print("KERNEL_OK")
</pallas_src>

<mosaic_0001>
module attributes {stable_mosaic.version = 11 : i64} {
  func.func @_style_loss_kernel(%arg0: i32, %arg1: memref<8x256xf32, #tpu.memory_space<vmem>>, %arg2: memref<8x256xf32, #tpu.memory_space<vmem>>, %arg3: memref<1x1xf32, #tpu.memory_space<smem>>, %arg4: memref<8x8xf32, #tpu.memory_space<vmem>>) attributes {dimension_semantics = [#tpu.dimension_semantics<arbitrary>], iteration_bounds = array<i64: 1>, scalar_prefetch = 0 : i64, scratch_operands = 1 : i64, tpu.core_type = #tpu.core_type<tc>, window_params = [{transform_indices = @transform_0, window_bounds = array<i64: 8, 256>}, {transform_indices = @transform_1, window_bounds = array<i64: 8, 256>}, {transform_indices = @transform_2, window_bounds = array<i64: 1, 1>}]} {
    %c0_i32 = arith.constant 0 : i32
    %0 = arith.cmpi eq, %arg0, %c0_i32 : i32
    %1 = arith.extui %0 : i1 to i32
    %c0_i32_0 = arith.constant 0 : i32
    %2 = arith.cmpi ne, %1, %c0_i32_0 : i32
    scf.if %2 {
      %cst_11 = arith.constant 0.000000e+00 : f32
      %14 = vector.broadcast %cst_11 : f32 to vector<8x8xf32>
      %c0_12 = arith.constant 0 : index
      %c0_13 = arith.constant 0 : index
      %15 = vector.load %arg4[%c0_12, %c0_13] : memref<8x8xf32, #tpu.memory_space<vmem>>, vector<8x8xf32>
      tpu.vector_store %arg4[%c0_12, %c0_13], %14 {strides = array<i32>} : memref<8x8xf32, #tpu.memory_space<vmem>>, vector<8x8xf32>,
    } else {
    }
    %c0 = arith.constant 0 : index
    %c0_1 = arith.constant 0 : index
    %3 = vector.load %arg1[%c0, %c0_1] : memref<8x256xf32, #tpu.memory_space<vmem>>, vector<8x256xf32>
    %c0_2 = arith.constant 0 : index
    %c0_3 = arith.constant 0 : index
    %4 = vector.load %arg2[%c0_2, %c0_3] : memref<8x256xf32, #tpu.memory_space<vmem>>, vector<8x256xf32>
    %cst = arith.constant dense<0.000000e+00> : vector<8x8xf32>
    %5 = tpu.matmul %3, %3, %cst {dimension_numbers = #tpu.dot_dimension_numbers<[1], [1], [0], [0], [0, 0, 1, 0], [], []>} : vector<8x256xf32>, vector<8x256xf32>, vector<8x8xf32> -> vector<8x8xf32>
    %cst_4 = arith.constant dense<0.000000e+00> : vector<8x8xf32>
    %6 = tpu.matmul %4, %4, %cst_4 {dimension_numbers = #tpu.dot_dimension_numbers<[1], [1], [0], [0], [0, 0, 1, 0], [], []>} : vector<8x256xf32>, vector<8x256xf32>, vector<8x8xf32> -> vector<8x8xf32>
    %c0_5 = arith.constant 0 : index
    %c0_6 = arith.constant 0 : index
    %7 = vector.load %arg4[%c0_5, %c0_6] : memref<8x8xf32, #tpu.memory_space<vmem>>, vector<8x8xf32>
    %8 = arith.subf %5, %6 : vector<8x8xf32>
    %9 = arith.addf %7, %8 : vector<8x8xf32>
    %c0_7 = arith.constant 0 : index
    %c0_8 = arith.constant 0 : index
    %10 = vector.load %arg4[%c0_7, %c0_8] : memref<8x8xf32, #tpu.memory_space<vmem>>, vector<8x8xf32>
    tpu.vector_store %arg4[%c0_7, %c0_8], %9 {strides = array<i32>} : memref<8x8xf32, #tpu.memory_space<vmem>>, vector<8x8xf32>,
    %c0_i32_9 = arith.constant 0 : i32
    %11 = arith.cmpi eq, %arg0, %c0_i32_9 : i32
    %12 = arith.extui %11 : i1 to i32
    %c0_i32_10 = arith.constant 0 : i32
    %13 = arith.cmpi ne, %12, %c0_i32_10 : i32
    scf.if %13 {
      %c0_11 = arith.constant 0 : index
      %c0_12 = arith.constant 0 : index
      %14 = vector.load %arg4[%c0_11, %c0_12] : memref<8x8xf32, #tpu.memory_space<vmem>>, vector<8x8xf32>
      %15 = arith.mulf %14, %14 : vector<8x8xf32>
      %16 = vector.shape_cast %15 : vector<8x8xf32> to vector<1x8x8xf32>
      %cst_13 = arith.constant dense<0.000000e+00> : vector<1xf32>
      %17 = vector.multi_reduction <add>, %16, %cst_13 [1, 2] : vector<1x8x8xf32> to vector<1xf32>
      %18 = vector.shape_cast %17 : vector<1xf32> to vector<1x1x1xf32>
      %19 = vector.extract %18[0, 0, 0] : f32 from vector<1x1x1xf32>
      %cst_14 = arith.constant 3.7252903E-9 : f32
      %20 = arith.mulf %19, %cst_14 : f32
      %c0_15 = arith.constant 0 : index
      %c0_16 = arith.constant 0 : index
      %21 = memref.load %arg3[%c0_15, %c0_16] : memref<1x1xf32, #tpu.memory_space<smem>>
      memref.store %20, %arg3[%c0_15, %c0_16] : memref<1x1xf32, #tpu.memory_space<smem>>
    } else {
    }
    return
  }
  func.func @transform_0(%arg0: i32) -> (i32, i32) {
    %c0_i32 = arith.constant 0 : i32
    %c0_i32_0 = arith.constant 0 : i32
    return %c0_i32, %arg0 : i32, i32
  }
  func.func @transform_1(%arg0: i32) -> (i32, i32) {
    %c0_i32 = arith.constant 0 : i32
    %c0_i32_0 = arith.constant 0 : i32
    return %c0_i32, %arg0 : i32, i32
  }
  func.func @transform_2(%arg0: i32) -> (i32, i32) {
    %c0_i32 = arith.constant 0 : i32
    %c0_i32_0 = arith.constant 0 : i32
    %c0_i32_1 = arith.constant 0 : i32
    return %c0_i32, %c0_i32_0 : i32, i32
  }
}

</mosaic_0001>

<bundles_post_ra>
// kernel: tpu_custom_call.1
= control target key start
LH: loop header
LB: loop body
LE: loop exit
PB: predicated region body
PF: predicated region fallthrough
CT: control target
= control target key end

     0   :  { %7 = vsyncpa [#allocation4], 0  ;;  %s312_s0 = inlined_call_operand.hbm [shape: f32[8,256], index: 0, kind: input, shape index: {}]   ;;  %s313_s1 = inlined_call_operand.hbm [shape: f32[8,256], index: 1, kind: input, shape index: {}]   ;;  %s314_s2 = inlined_call_operand.hbm [shape: f32[1,1], index: 2, kind: output, shape index: {}]  }
   0x1   :  { %8 = vsyncpa [#allocation7], 0 }
   0x2   :  { %9 = vsyncpa [#allocation5], 0  ;;  %s284_s9 = smov [#allocation3]   ;;  %s285_s11 = smov [#allocation6]  }
   0x3   :  { %s16_s10 = sshll.u32 %s284_s9, 4  ;;  %s26_s12 = sshll.u32 %s285_s11, 4  ;;  %s17_s10 = int_to_ptr.vmem [resolvable:$true] %s16_s10  ;;  %s27_s12 = int_to_ptr.vmem [resolvable:$true] %s26_s12 }
   0x4   :  { %s238_s13 = scalar_lea.vmem %s17_s10, 256  ;;  %p243_p1 = scmp.lt.s32.totalorder %s17_s10, %s17_s10 }
   0x5   :  { %p239_p0 = scmp.ne.s32.totalorder %s17_s10, %s238_s13  ;;  %p244_p2 = scmp.lt.s32.totalorder %s238_s13, %s238_s13 }
   0x7   :  { %p245_p3 = por %p244_p2, %p243_p1 }
   0x9   :  { %p246_p4 = pnand %p245_p3, %p239_p0 }
   0xb   :  { %249 = shalt.err (!%p246_p4)
}
   0xc   :  { %19 = dma.hbm_to_vmem [thread:$0]  %s312_s0, 256, %s17_s10, [#allocation4]  }
   0xd   :  { %s258_s16 = scalar_lea.vmem %s27_s12, 256  ;;  %p263_p6 = scmp.lt.s32.totalorder %s27_s12, %s27_s12 }
   0xe   :  { %p259_p5 = scmp.ne.s32.totalorder %s27_s12, %s258_s16  ;;  %p264_p7 = scmp.lt.s32.totalorder %s258_s16, %s258_s16 }
  0x10   :  { %p265_p8 = por %p264_p7, %p263_p6 }
  0x12   :  { %p266_p9 = pnand %p265_p8, %p259_p5 }
  0x14   :  { %269 = shalt.err (!%p266_p9)
}
  0x15   :  { %29 = dma.hbm_to_vmem [thread:$0]  %s313_s1, 256, %s27_s12, [#allocation7]  }
  0x16   :  { %278 = dma.done.wait [#allocation4], 256  }
  0x17   :  { %279 = vsyncadd [#allocation4], 4294967040 }
  0x18   :  { %280 = dma.done.wait [#allocation7], 256  }
  0x19   :  { %281 = vsyncadd [#allocation7], 4294967040  ;;  %v43_v0 = vld [vmem:[#allocation3 + $0x8] sm:$0xff]  ;;  %v45_v1 = vld [vmem:[#allocation6 + $0x8] sm:$0xff]  ;;  %vm40_vm0 = vcmask 64512   ;;  %v286_v4 = vmov 0.0  }
  0x1a   :  { %v42_v2 = vld [vmem:[#allocation3] sm:$0xff]  ;;  %76 = vmatprep.subr.mxu0 %v43_v0  ;;  %146 = vmatprep.subr.mxu1 %v45_v1  ;;  %v44_v3 = vld [vmem:[#allocation6] sm:$0xff]  ;;  %41 = vst.msk [vmem:[#allocation2] sm:$0xff] %vm40_vm0, %v286_v4  ;;  %s287_s19 = smov [#allocation8]  }
  0x1b   :  { %77 = vmatpush1.xpose.msra.mxu0 %v42_v2  ;;  %147 = vmatpush1.xpose.msra.mxu1 %v44_v3 }
  0x1c   :  { %110 = vmatprep.mubr.f32.mxu0 %v43_v0  ;;  %180 = vmatprep.mubr.f32.mxu1 %v45_v1 }
  0x1e   :  { %111 = vmatmul.mubr.f32.vlgmr.msra.gmra.mxu0 %v42_v2  ;;  %181 = vmatmul.mubr.f32.vlgmr.msra.gmra.mxu1 %v44_v3 }
  0x21   :  { %v186_v7 = vld [vmem:[#allocation2] sm:$0xff] }
  0xde   :  { %v112_v5 = vpop.f32.mrf.mxu0  ;;  %v182_v6 = vpop.f32.mrf.mxu1 }
  0xdf   :  { %v187_v8 = vsub.f32 %v112_v5, %v182_v6 }
  0xe0   :  { %v114_v9 = vpop.f32.mrf.mxu0  ;;  %v184_v10 = vpop.f32.mrf.mxu1 }
  0xe1   :  { %v188_v11 = vadd.f32 %v187_v8, %v186_v7 }
  0xe3   :  { %190 = vst.msk [vmem:[#allocation2] sm:$0xff] %vm40_vm0, %v188_v11 }
  0xea   :  { %v194_v12 = vld [vmem:[#allocation2] sm:$0xff] }
  0xeb   :  { %v195_v13 = vmul.f32 %v194_v12, %v194_v12 }
  0xed   :  { %v196_v14 = vsel %vm40_vm0, %v195_v13, 0.0 }
  0xee   :  { %197 = vadd.xlane.f32.xlu0 %v196_v14 }
 0x177   :  { %v198_v15 = vpop.xlane.xlu0 %197 }
 0x178   :  { %v199_v16 = vrot.slane %v198_v15, 4 }
 0x17a   :  { %v200_v17 = vadd.f32 %v199_v16, %v198_v15 }
 0x17c   :  { %v201_v18 = vrot.slane %v200_v17, 2 }
 0x17e   :  { %v202_v19 = vadd.f32 %v201_v18, %v200_v17 }
 0x180   :  { %v203_v20 = vrot.slane %v202_v19, 1 }
 0x182   :  { %v204_v21 = vadd.f32 %v203_v20, %v202_v19 }
 0x184   :  { %224 = vpush %v204_v21 }
 0x1b5   :  { %s225_s0 = spop %224 }
 0x1b6   :  { %s206_s1 = smul.f32 3.7252903e-09, %s225_s0 }
 0x1b8   :  { %208 = sst [smem:[#allocation8]] %s206_s1 }
 0x1b9   :  { %216 = dma.smem_to_hbm %s287_s19, 16, %s314_s2, [#allocation5]  }
 0x1ba   :  { %282 = dma.done.wait [#allocation5], 16  }
 0x1bb   :  { %283 = vsyncadd [#allocation5], 4294967280 }
 0x1bc   :  { %220 = sfence }
 0x1bd   :  { %221 = vsyncpa [#allocation4], 1 }
 0x1be   :  { %222 = vsyncpa [#allocation7], 1 }
 0x1bf   :  { %223 = vsyncpa [#allocation5], 1 }

</bundles_post_ra>
